<compile_context>
chip_gen: v5e
topology: v5e:2x2
jax: 0.10.0
libtpu: 0.0.40
codegen_flags: <defaults>
</compile_context>

<pallas_src>
import jax
import jax.numpy as jnp
from jax.experimental import pallas as pl
from jax.experimental.pallas import tpu as pltpu


def _channel_attention_kernel(x_ref, w1_ref, w2_ref, o_ref):
    # x_ref block: (bt, C, HW) in the input dtype (no padding anywhere).
    xb = x_ref[...]
    bt, c, hw = xb.shape

    # Global average / max pooling over the spatial (lane) axis.
    # f32 accumulation for the sum; max is exact in the native dtype.
    avg = jnp.sum(xb, axis=-1, dtype=jnp.float32) * (1.0 / hw)     # (bt, C) f32
    mx = jnp.max(xb, axis=-1).astype(jnp.float32)                  # (bt, C) f32

    w1 = w1_ref[...]                                               # (C, hidden) f32
    w2 = w2_ref[...]                                               # (hidden, C) f32

    def fc(v):
        h = jnp.maximum(jnp.dot(v, w1, preferred_element_type=jnp.float32), 0.0)
        return jnp.dot(h, w2, preferred_element_type=jnp.float32)  # (bt, C)

    a = jax.nn.sigmoid(fc(avg) + fc(mx))                           # (bt, C) f32
    scale = (1.0 + a)[:, :, None]                                  # (bt, C, 1)

    # out = x + a*x  ==  x * (1 + a); cast only at the store.
    o_ref[...] = (xb.astype(jnp.float32) * scale).astype(o_ref.dtype)


def _pick_batch_tile(B, bytes_per_image):
    """Largest divisor of B that fits a ~4 MiB block budget and leaves >=2 grid steps."""
    block_budget = 4 * 1024 * 1024
    bt_budget = max(1, block_budget // max(1, bytes_per_image))
    cap = max(1, min(bt_budget, B // 2 if B >= 2 else 1))
    for d in range(cap, 0, -1):
        if B % d == 0:
            return d
    return 1


def channel_attention(x_nchw, w1_t, w2_t):
    """x_nchw: (B, C, H, W); w1_t: (C, hidden); w2_t: (hidden, C) (pre-transposed FC weights)."""
    B, C, H, W = x_nchw.shape
    HW = H * W
    hidden = w1_t.shape[1]
    elem = jnp.dtype(x_nchw.dtype).itemsize

    # Weights to f32 once in the wrapper (tiny), so the kernel does no astype.
    w1f = w1_t.astype(jnp.float32)
    w2f = w2_t.astype(jnp.float32)

    x = x_nchw.reshape(B, C, HW)

    bytes_per_image = C * HW * elem
    bt = _pick_batch_tile(B, bytes_per_image)
    grid = (B // bt,)

    block_bytes = bt * C * HW * elem
    w_bytes = 2 * C * hidden * 4
    # in + out blocks double-buffered (4x block) + f32 store temp headroom + weights.
    vmem_limit = int(min(64 * 1024 * 1024,
                         max(8 * 1024 * 1024,
                             6 * block_bytes + 2 * w_bytes + (1 << 20))))

    cost = pl.CostEstimate(
        flops=int(3 * B * C * HW                         # pooling + scale elementwise
                  + 2 * 2 * 2 * B * C * hidden),         # four small FC matmuls
        transcendentals=int(B * C),                      # sigmoid
        bytes_accessed=int(2 * B * C * HW * elem + w_bytes),
    )

    out = pl.pallas_call(
        _channel_attention_kernel,
        out_shape=jax.ShapeDtypeStruct((B, C, HW), x.dtype),
        grid_spec=pltpu.PrefetchScalarGridSpec(
            num_scalar_prefetch=0,
            grid=grid,
            in_specs=[
                pl.BlockSpec((bt, C, HW), lambda i: (i, 0, 0)),
                pl.BlockSpec((C, hidden), lambda i: (0, 0)),
                pl.BlockSpec((hidden, C), lambda i: (0, 0)),
            ],
            out_specs=pl.BlockSpec((bt, C, HW), lambda i: (i, 0, 0)),
        ),
        compiler_params=pltpu.CompilerParams(
            dimension_semantics=("parallel",),
            vmem_limit_bytes=vmem_limit,
        ),
        cost_estimate=cost,
    )(x, w1f, w2f)

    return out.reshape(B, C, H, W)


def reference(x, w1_t, w2_t):
    avg = jnp.mean(x, axis=(2, 3))                       # (B, C)
    mx = jnp.max(x, axis=(2, 3))                         # (B, C)

    def fc(v):
        return jnp.maximum(v @ w1_t, 0.0) @ w2_t

    a = jax.nn.sigmoid(fc(avg) + fc(mx))[:, :, None, None]
    return x + a * x


if __name__ == "__main__":
    B, C, H, W = 2, 32, 16, 16
    reduction_ratio = 16
    hidden = C // reduction_ratio                        # 2

    key = jax.random.PRNGKey(0)
    kx, k1, k2 = jax.random.split(key, 3)

    x = jax.random.normal(kx, (B, C, H, W), dtype=jnp.float32)

    # Deterministic kaiming_normal init matching PyTorch semantics:
    #   fc[0].weight: (hidden, C), fan_in=C, relu gain sqrt(2)   -> std = sqrt(2/C)
    #   fc[2].weight: (C, hidden), fan_in=hidden, linear gain 1  -> std = sqrt(1/hidden)
    w1 = jax.random.normal(k1, (hidden, C), dtype=jnp.float32) * jnp.sqrt(2.0 / C)
    w2 = jax.random.normal(k2, (C, hidden), dtype=jnp.float32) * jnp.sqrt(1.0 / hidden)

    # Kernel consumes transposed weights (row-vector @ matrix form).
    w1_t = w1.T                                          # (C, hidden)
    w2_t = w2.T                                          # (hidden, C)

    out = channel_attention(x, w1_t, w2_t)
    out = jax.block_until_ready(out)

    ref = reference(x, w1_t, w2_t)
    assert out.shape == ref.shape, "shape mismatch vs reference"
    assert jnp.allclose(out, ref, atol=1e-5, rtol=1e-5), "mismatch vs reference"

    print("KERNEL_OK")
</pallas_src>

<mosaic_0001>
module attributes {stable_mosaic.version = 11 : i64} {
  func.func @_channel_attention_kernel(%arg0: i32, %arg1: memref<1x32x256xf32, #tpu.memory_space<vmem>>, %arg2: memref<32x2xf32, #tpu.memory_space<vmem>>, %arg3: memref<2x32xf32, #tpu.memory_space<vmem>>, %arg4: memref<1x32x256xf32, #tpu.memory_space<vmem>>) attributes {dimension_semantics = [#tpu.dimension_semantics<parallel>], iteration_bounds = array<i64: 2>, scalar_prefetch = 0 : i64, scratch_operands = 0 : i64, tpu.core_type = #tpu.core_type<tc>, window_params = [{transform_indices = @transform_0, window_bounds = array<i64: 1, 32, 256>}, {pipeline_mode = #tpu.pipeline_mode<synchronous>, transform_indices = @transform_1, window_bounds = array<i64: 32, 2>}, {pipeline_mode = #tpu.pipeline_mode<synchronous>, transform_indices = @transform_2, window_bounds = array<i64: 2, 32>}, {transform_indices = @transform_3, window_bounds = array<i64: 1, 32, 256>}]} {
    %c0 = arith.constant 0 : index
    %c0_0 = arith.constant 0 : index
    %c0_1 = arith.constant 0 : index
    %0 = vector.load %arg1[%c0, %c0_0, %c0_1] : memref<1x32x256xf32, #tpu.memory_space<vmem>>, vector<1x32x256xf32>
    %cst = arith.constant dense<0.000000e+00> : vector<1x32xf32>
    %1 = vector.multi_reduction <add>, %0, %cst [2] : vector<1x32x256xf32> to vector<1x32xf32>
    %cst_2 = arith.constant 3.906250e-03 : f32
    %2 = vector.broadcast %cst_2 : f32 to vector<1x32xf32>
    %3 = arith.mulf %1, %2 : vector<1x32xf32>
    %cst_3 = arith.constant dense<0xFF800000> : vector<1x32xf32>
    %4 = vector.multi_reduction <maximumf>, %0, %cst_3 [2] : vector<1x32x256xf32> to vector<1x32xf32>
    %c0_4 = arith.constant 0 : index
    %c0_5 = arith.constant 0 : index
    %5 = vector.load %arg2[%c0_4, %c0_5] : memref<32x2xf32, #tpu.memory_space<vmem>>, vector<32x2xf32>
    %c0_6 = arith.constant 0 : index
    %c0_7 = arith.constant 0 : index
    %6 = vector.load %arg3[%c0_6, %c0_7] : memref<2x32xf32, #tpu.memory_space<vmem>>, vector<2x32xf32>
    %cst_8 = arith.constant dense<0.000000e+00> : vector<1x2xf32>
    %7 = tpu.matmul %3, %5, %cst_8 {dimension_numbers = #tpu.dot_dimension_numbers<[1], [0], [0], [1], [0, 0, 1, 1], [], []>} : vector<1x32xf32>, vector<32x2xf32>, vector<1x2xf32> -> vector<1x2xf32>
    %cst_9 = arith.constant 0.000000e+00 : f32
    %8 = vector.broadcast %cst_9 : f32 to vector<1x2xf32>
    %9 = arith.maximumf %7, %8 : vector<1x2xf32>
    %cst_10 = arith.constant dense<0.000000e+00> : vector<1x32xf32>
    %10 = tpu.matmul %9, %6, %cst_10 {dimension_numbers = #tpu.dot_dimension_numbers<[1], [0], [0], [1], [0, 0, 1, 1], [], []>} : vector<1x2xf32>, vector<2x32xf32>, vector<1x32xf32> -> vector<1x32xf32>
    %cst_11 = arith.constant dense<0.000000e+00> : vector<1x2xf32>
    %11 = tpu.matmul %4, %5, %cst_11 {dimension_numbers = #tpu.dot_dimension_numbers<[1], [0], [0], [1], [0, 0, 1, 1], [], []>} : vector<1x32xf32>, vector<32x2xf32>, vector<1x2xf32> -> vector<1x2xf32>
    %cst_12 = arith.constant 0.000000e+00 : f32
    %12 = vector.broadcast %cst_12 : f32 to vector<1x2xf32>
    %13 = arith.maximumf %11, %12 : vector<1x2xf32>
    %cst_13 = arith.constant dense<0.000000e+00> : vector<1x32xf32>
    %14 = tpu.matmul %13, %6, %cst_13 {dimension_numbers = #tpu.dot_dimension_numbers<[1], [0], [0], [1], [0, 0, 1, 1], [], []>} : vector<1x2xf32>, vector<2x32xf32>, vector<1x32xf32> -> vector<1x32xf32>
    %15 = arith.addf %10, %14 : vector<1x32xf32>
    %16 = arith.negf %15 : vector<1x32xf32>
    %17 = math.exp %16 : vector<1x32xf32>
    %cst_14 = arith.constant 1.000000e+00 : f32
    %18 = vector.broadcast %cst_14 : f32 to vector<1x32xf32>
    %19 = arith.addf %18, %17 : vector<1x32xf32>
    %20 = arith.divf %18, %19 : vector<1x32xf32>
    %cst_15 = arith.constant 1.000000e+00 : f32
    %21 = vector.broadcast %cst_15 : f32 to vector<1x32xf32>
    %22 = arith.addf %21, %20 : vector<1x32xf32>
    %23 = vector.shape_cast %22 : vector<1x32xf32> to vector<1x32x1xf32>
    %24 = vector.broadcast %23 : vector<1x32x1xf32> to vector<1x32x256xf32>
    %25 = arith.mulf %0, %24 : vector<1x32x256xf32>
    %c0_16 = arith.constant 0 : index
    %c0_17 = arith.constant 0 : index
    %c0_18 = arith.constant 0 : index
    %26 = vector.load %arg4[%c0_16, %c0_17, %c0_18] : memref<1x32x256xf32, #tpu.memory_space<vmem>>, vector<1x32x256xf32>
    tpu.vector_store %arg4[%c0_16, %c0_17, %c0_18], %25 {strides = array<i32>} : memref<1x32x256xf32, #tpu.memory_space<vmem>>, vector<1x32x256xf32>,
    return
  }
  func.func @transform_0(%arg0: i32) -> (i32, i32, i32) {
    %c0_i32 = arith.constant 0 : i32
    %c0_i32_0 = arith.constant 0 : i32
    %c0_i32_1 = arith.constant 0 : i32
    return %arg0, %c0_i32, %c0_i32_0 : i32, i32, i32
  }
  func.func @transform_1(%arg0: i32) -> (i32, i32) {
    %c0_i32 = arith.constant 0 : i32
    %c0_i32_0 = arith.constant 0 : i32
    %c0_i32_1 = arith.constant 0 : i32
    return %c0_i32, %c0_i32_0 : i32, i32
  }
  func.func @transform_2(%arg0: i32) -> (i32, i32) {
    %c0_i32 = arith.constant 0 : i32
    %c0_i32_0 = arith.constant 0 : i32
    %c0_i32_1 = arith.constant 0 : i32
    return %c0_i32, %c0_i32_0 : i32, i32
  }
  func.func @transform_3(%arg0: i32) -> (i32, i32, i32) {
    %c0_i32 = arith.constant 0 : i32
    %c0_i32_0 = arith.constant 0 : i32
    %c0_i32_1 = arith.constant 0 : i32
    return %arg0, %c0_i32, %c0_i32_0 : i32, i32, i32
  }
}

</mosaic_0001>

<bundles_post_ra>
// kernel: tpu_custom_call.1
= control target key start
LH: loop header
LB: loop body
LE: loop exit
PB: predicated region body
PF: predicated region fallthrough
CT: control target
= control target key end

     0   :  { %8 = vsyncpa [#allocation3], 0  ;;  %s902_s0 = inlined_call_operand.hbm [shape: f32[2,32,256], index: 0, kind: input, shape index: {}]   ;;  %s903_s1 = inlined_call_operand.vmem [shape: f32[32,2], index: 1, kind: input, shape index: {}]   ;;  %s904_s2 = inlined_call_operand.vmem [shape: f32[2,32], index: 2, kind: input, shape index: {}]   ;;  %s905_s3 = inlined_call_operand.hbm [shape: f32[2,32,256], index: 3, kind: output, shape index: {}]  }
   0x1   :  { %10 = vsyncpa [#allocation3 + $0x1], 0 }
   0x2   :  { %11 = vsyncpa [#allocation4], 0 }
   0x3   :  { %13 = vsyncpa [#allocation4 + $0x1], 0  ;;  %s714_s12 = smov 0   ;;  %s716_s13 = smov 0  }
   0x4   :  { %s718_s14 = smov 0   ;;  %s720_s15 = smov 0  }
   0x5 LB: > { %s735_s16 = sadd.s32 4294967295, %s688_s15   ;;  %s510_s17 = sadd.s32 4294967294, %s688_s15   ;;  %s688_s15 = sphi %s720_s15, %s915_s15   ;;  %s684_s14 = sphi %s718_s14, %s914_s14   ;;  %s680_s13 = sphi %s716_s13, %s913_s13   ;;  %s676_s12 = sphi %s714_s12, %s912_s12  }
   0x6   : > { %s739_s18 = sadd.s32 1, %s688_s15   ;;  %s26_s19 = sadd.s32 1, %s684_s14 }
   0x7   : > { %s23_s20 = ssub.s32 %s688_s15, %s739_s18  ;;  %p33_p0 = scmp.ne.s32.totalorder %s684_s14, %s680_s13 }
   0x8   : > { %p24_p1 = scmp.eq.s32.totalorder %s23_s20, 0  ;;  %p34_p2 = scmp.eq.s32.totalorder %s688_s15, 0 }
   0x9   : > { %p39_p3 = scmp.ne.s32.totalorder %s680_s13, %s676_s12  ;;  %p40_p4 = scmp.eq.s32.totalorder %s735_s16, 0 }
   0xa   : > { %s751_s21 = scalar_select %p24_p1, %s684_s14, %s26_s19  }
   0xb   : > { %p753_p5 = por %p34_p2, %p33_p0  ;;  %p757_p6 = por %p40_p4, %p39_p3 }
   0xc   : > { %p105_p7 = scmp.eq.s32.totalorder %s735_s16, 1  ;;  %p111_p8 = scmp.eq.s32.totalorder %s510_s17, 1 }
   0xd   : > { %p545_p10 = scmp.lt.s32.totalorder %s688_s15, 2  ;;  %s137_s26 = sand.u32 1, %s684_s14  }
   0xe   : > { %p764_p11 = por %p105_p7, %p33_p0  ;;  %p768_p12 = por %p111_p8, %p39_p3 }
   0xf   : > { %s531_s27 = sshll.u32 %s688_s15, 6  ;;  %s513_s28 = sshll.u32 %s137_s26, 6 }
  0x10   : > { %s146_s4 = scalar_lea.hbm %s902_s0, %s531_s27  ;;  %s141_s6 = scalar_lea.vmem [#allocation2], %s513_s28 }
  0x11   : > { %s147_s5 = sshll.u32 %s146_s4, 4  ;;  %s149_s7 = sshll.u32 %s141_s6, 4  ;;  %s148_s5 = int_to_ptr.hbm [resolvable:$true] %s147_s5  ;;  %s150_s7 = int_to_ptr.vmem [resolvable:$true] %s149_s7 }
  0x12   : > { %p779_p13 = pnand %p545_p10, %p753_p5  ;;  %p516_p0 = scmp.ge.s32.totalorder %s688_s15, 1 }
  0x13   : > { %p157_p1 = scmp.lt.s32.totalorder %s688_s15, 3  ;;  %s138_s9 = scalar_lea.sflag [#allocation3], %s137_s26 }
  0x14   : > { %s592_s10 = sshra.s32 %s148_s5, 4  ;;  %p596_p3 = pneg %p779_p13  ;;  %s593_s10 = int_to_ptr.hbm [resolvable:$true] %s592_s10 }
  0x15   : > { %s594_s11 = scalar_lea.hbm %s593_s10, 64  ;;  %s599_s20 = scalar_lea.hbm %s902_s0, 128 }
  0x16   : > { %p595_p2 = scmp.ne.s32.totalorder %s593_s10, %s594_s11  ;;  %p600_p5 = scmp.lt.s32.totalorder %s593_s10, %s902_s0 }
  0x17   : > { %p601_p8 = scmp.lt.s32.totalorder %s599_s20, %s594_s11 }
  0x18   : > { %p597_p4 = pnand %p596_p3, %p595_p2 }
  0x19   : > { %p602_p10 = por %p601_p8, %p600_p5 }
  0x1a   : > { %p598_p7 = pneg %p597_p4 }
  0x1c   : > { %p603_p9 = pnand %p602_p10, %p598_p7 }
  0x1e   : > { %606 = shalt.err (!%p603_p9)
}
  0x1f   : > { %s690_s26 = smov 256   ;;  %s691_s28 = smov 16  }
  0x20   : > { %540 = dma.hbm_to_vmem [thread:$0]  (!%p779_p13), %s148_s5, 1024, %s150_s7, %s138_s9, %s690_s26, %s690_s26, %s691_s28  }
  0x21   : > { %p158_p2 = pnand %p516_p0, %p157_p1 }
  0x22   : > { %s800_s29 = sand.u32 (!%p158_p2), 1, %s680_s13  }
  0x23   : > { %161 = sbr.rel (%p158_p2) target bundleno = 598 (0x256), region = 32  ;;  %s517_s30 = sshll.u32 (!%p158_p2), %s800_s29, 6 }
  0x24   : > { %s164_s4 = scalar_lea.sflag (!%p158_p2), [#allocation3], %s800_s29  ;;  %s167_s6 = scalar_lea.vmem (!%p158_p2), [#allocation2], %s517_s30 }
  0x28   : > { %667 = dma.done.wait (%p757_p6), %s164_s4, 1024  }
  0x29   : > { %669 = vsyncadd (%p757_p6), %s164_s4, 4294966272  ;;  %v810_v0 = vld [vmem:[%s167_s6] sm:$0xff]  ;;  %v812_v1 = vld [vmem:[%s167_s6 + $0x8] sm:$0xff]  ;;  %v236_v20 = vlaneseq  ;;  %vm245_vm0 = vcmask 195712   ;;  %vm241_vm1 = vcmask 130112   ;;  %vm249_vm2 = vcmask 261312  }
  0x2a   : > { %v814_v2 = vld [vmem:[%s167_s6 + $0x20] sm:$0xff]  ;;  %v215_v3 = vmax.f32 %v810_v0, %v812_v1  ;;  %v199_v4 = vadd.f32 %v812_v1, %v810_v0  ;;  %v820_v5 = vld [vmem:[%s167_s6 + $0x28] sm:$0xff]  ;;  %v824_v7 = vld [vmem:[%s167_s6 + $0x10] sm:$0xff]  ;;  %vm251_vm3 = vcmask 261120   ;;  %vm313_vm4 = vcmask 1041408   ;;  %s190_s22 = scalar_lea.vmem [#allocation5], %s517_s30 }
  0x2b   : > { %v205_v6 = vadd.f32 %v820_v5, %v814_v2  ;;  %v826_v8 = vld [vmem:[%s167_s6 + $0x18] sm:$0xff]  ;;  %v828_v9 = vld [vmem:[%s167_s6 + $0x30] sm:$0xff]  ;;  %v221_v14 = vmax.f32 %v814_v2, %v820_v5  ;;  %v228_v18 = vld [vmem:[%s903_s1 + $0x8] sm:$0xff]  ;;  %v237_v24 = vand.u32 127, %v236_v20  ;;  %vm309_vm5 = vcmask 15360   ;;  %s532_s27 = sshll.u32 %s735_s16, 6 }
  0x2c   : > { %216 = vmax.xlane.f32.xlu2 %v215_v3  ;;  %200 = vadd.xlane.f32.xlu0 %v199_v4  ;;  %v830_v10 = vld [vmem:[%s167_s6 + $0x38] sm:$0xff]  ;;  %v218_v11 = vmax.f32 %v824_v7, %v826_v8  ;;  %v202_v12 = vadd.f32 %v826_v8, %v824_v7  ;;  %v229_v17 = vld [vmem:[%s903_s1 + $0x10] sm:$0xff]  ;;  %v227_v19 = vld [vmem:[%s903_s1] sm:$0xff]  ;;  %v382_v56 = vshrl.u32 %v236_v20, 7  ;;  %s433_s4 = scalar_lea.hbm %s905_s3, %s532_s27  ;;  %s434_s6 = sshll.u32 %s190_s22, 4  ;;  %s435_s6 = int_to_ptr.vmem [resolvable:$true] %s434_s6 }
  0x2d   : > { %206 = vadd.xlane.f32.xlu1 %v205_v6  ;;  %v208_v13 = vadd.f32 %v830_v10, %v828_v9  ;;  %v224_v15 = vmax.f32 %v828_v9, %v830_v10  ;;  %v230_v16 = vld [vmem:[%s903_s1 + $0x18] sm:$0xff]  ;;  %v243_v26 = vadd.s32 4294967280, %v237_v24  ;;  %v247_v29 = vadd.s32 4294967272, %v237_v24  ;;  %v231_v51 = vld [vmem:[%s904_s2] sm:$0x3]  ;;  %s436_s23 = sshll.u32 %s433_s4, 4  ;;  %s437_s23 = int_to_ptr.hbm [resolvable:$true] %s436_s23 }
  0x2e   : > { %266 = vmatpush.msra.mxu0 %v230_v16  ;;  %300 = vmatpush.msra.mxu1 %v230_v16  ;;  %v239_v30 = vadd.s32 4294967288, %v237_v24  ;;  %v395_v57 = vadd.s32 16, %v382_v56  ;;  %v389_v58 = vadd.s32 8, %v382_v56  ;;  %s422_s16 = scalar_lea.sflag [#allocation4], %s800_s29  ;;  %s636_s30 = sshra.s32 %s437_s23, 4  ;;  %s637_s30 = int_to_ptr.hbm [resolvable:$true] %s636_s30 }
  0x2f   : > { %523 = vmatpush.msk.msra.mxu3 %vm313_vm4, %v231_v51  ;;  %521 = vmatpush.msk.msra.mxu2 %vm313_vm4, %v231_v51  ;;  %s638_s5 = scalar_lea.hbm %s637_s30, 64  ;;  %s642_s9 = scalar_lea.hbm %s905_s3, 128 }
  0x30   : > { %267 = vmatpush.msra.mxu0 %v229_v17  ;;  %301 = vmatpush.msra.mxu1 %v229_v17  ;;  %p639_p6 = scmp.ne.s32.totalorder %s637_s30, %s638_s5  ;;  %p643_p0 = scmp.lt.s32.totalorder %s637_s30, %s905_s3 }
  0x31   : > { %583 = vset.pattern.permute.xlu2 %v382_v56  ;;  %585 = vset.pattern.permute.xlu1 %v395_v57  ;;  %p644_p1 = scmp.lt.s32.totalorder %s642_s9, %s638_s5 }
  0x32   : > { %268 = vmatpush.msra.mxu0 %v228_v18  ;;  %302 = vmatpush.msra.mxu1 %v228_v18  ;;  %p640_p9 = pnand %p639_p6, %p764_p11 }
  0x33   : > { %584 = vset.pattern.permute.xlu0 %v389_v58  ;;  %p645_p3 = por %p644_p1, %p643_p0 }
  0x34   : > { %219 = vmax.xlane.f32.xlu2 %v218_v11  ;;  %203 = vadd.xlane.f32.xlu0 %v202_v12  ;;  %p641_p13 = pneg %p640_p9 }
  0x35   : > { %209 = vadd.xlane.f32.xlu1 %v208_v13  ;;  %269 = vmatpush.msra.mxu0 %v227_v19 }
  0x36   : > { %303 = vmatpush.msra.mxu1 %v227_v19  ;;  %p646_p4 = pnand %p645_p3, %p641_p13 }
  0x3c   : > { %222 = vmax.xlane.f32.xlu0 %v221_v14 }
  0x3d   : > { %225 = vmax.xlane.f32.xlu1 %v224_v15 }
  0x9f   : > { %v201_v21 = vpop.xlane.xlu0 %200  ;;  %v217_v22 = vpop.xlane.xlu2 %216 }
  0xa0   : > { %v207_v23 = vpop.xlane.xlu1 %206  ;;  %v211_v25 = vmul.f32 0.00390625, %v201_v21  ;;  %v279_v40 = vperm.slane %v217_v22, %v237_v24  ;;  %v401_v21 = vadd.s32 24, %v382_v56 }
  0xa1   : > { %v213_v27 = vmul.f32 0.00390625, %v207_v23 }
  0xa2   : > { %v238_v34 = vperm.slane %v211_v25, %v237_v24 }
  0xa3   : > { %v244_v37 = vperm.slane %v213_v27, %v243_v26 }
  0xa7   : > { %v204_v28 = vpop.xlane.xlu0 %203  ;;  %v220_v35 = vpop.xlane.xlu2 %219 }
  0xa8   : > { %v212_v31 = vmul.f32 0.00390625, %v204_v28  ;;  %v210_v32 = vpop.xlane.xlu1 %209  ;;  %v280_v41 = vperm.slane %v220_v35, %v239_v30 }
  0xa9   : > { %v214_v33 = vmul.f32 0.00390625, %v210_v32 }
  0xaa   : > { %v240_v36 = vperm.slane %v212_v31, %v239_v30  ;;  %v281_v47 = vsel %vm241_vm1, %v280_v41, %v279_v40 }
  0xab   : > { %v248_v38 = vperm.slane %v214_v33, %v247_v29 }
  0xac   : > { %v242_v39 = vsel %vm241_vm1, %v240_v36, %v238_v34 }
  0xad   : > { %v246_v42 = vsel %vm245_vm0, %v244_v37, %v242_v39 }
  0xae   : > { %v250_v43 = vsel %vm249_vm2, %v248_v38, %v246_v42 }
  0xaf   : > { %519 = vmatmul.msk.f32.vlgmr.msra.gmra.mxu0 %vm251_vm3, %v250_v43  ;;  %v223_v44 = vpop.xlane.xlu0 %222 }
  0xb0   : > { %v282_v45 = vperm.slane %v223_v44, %v243_v26  ;;  %v226_v46 = vpop.xlane.xlu1 %225 }
  0xb1   : > { %v284_v48 = vperm.slane %v226_v46, %v247_v29 }
  0xb2   : > { %v283_v49 = vsel %vm245_vm0, %v282_v45, %v281_v47 }
  0xb3   : > { %v285_v50 = vsel %vm249_vm2, %v284_v48, %v283_v49 }
  0xb4   : > { %520 = vmatmul.msk.f32.vlgmr.msra.gmra.mxu1 %vm251_vm3, %v285_v50 }
 0x12c   : > { %v271_v52 = vpop.f32.mrf.mxu0 }
 0x12d   : > { %v274_v53 = vmax.f32 %v271_v52, 0.0 }
 0x12f   : > { %524 = vmatmul.msk.f32.vlgmr.msra.gmra.mxu3 %vm309_vm5, %v274_v53 }
 0x131   : > { %v305_v54 = vpop.f32.mrf.mxu1 }
 0x132   : > { %v308_v55 = vmax.f32 %v305_v54, 0.0 }
 0x134   : > { %522 = vmatmul.msk.f32.vlgmr.msra.gmra.mxu2 %vm309_vm5, %v308_v55 }
 0x1b2   : > { %v357_v59 = vpop.f32.mrf.mxu3 }
 0x1b7   : > { %v334_v60 = vpop.f32.mrf.mxu2 }
 0x1b8   : > { %v358_v61 = vadd.f32 %v357_v59, %v334_v60 }
 0x1ba   : > { %v525_v62 = vmul.f32 -1.442695, %v358_v61 }
 0x1bc   : > { %588 = vpow2.f32 %v525_v62 }
 0x1c2   : > { %v589_v63 = vpop.eup %588 }
 0x1c3   : > { %v363_v3 = vadd.f32 1.0, %v589_v63 }
 0x1c5   : > { %590 = vrcp.f32 %v363_v3  ;;  %v375_v12 = vand.u32 2147483648, %v363_v3  ;;  %v373_v14 = vand.u32 2147483647, %v363_v3  ;;  %vm369_vm7 = vweird.f32 %v363_v3 }
 0x1c7   : > { %v376_v16 = vor.u32 1.1754944e-38, %v375_v12  ;;  %vm374_vm9 = vcmp.eq.f32.partialorder %v373_v14, 8.507059e+37 }
 0x1cb   : > { %v591_v4 = vpop.eup %590 }
 0x1cc   : > { %v365_v6 = vmul.f32 %v591_v4, %v363_v3  ;;  %vm370_vm6 = vweird.f32 %v591_v4 }
 0x1cd   : > { %vm371_vm8 = vmor %vm369_vm7, %vm370_vm6 }
 0x1ce   : > { %v366_v11 = vsub.f32 1.0, %v365_v6 }
 0x1d0   : > { %v367_v13 = vmul.f32 %v591_v4, %v366_v11 }
 0x1d2   : > { %v368_v15 = vadd.f32 %v591_v4, %v367_v13 }
 0x1d4   : > { %v372_v17 = vsel %vm371_vm8, %v591_v4, %v368_v15 }
 0x1d5   : > { %v377_v18 = vsel %vm374_vm9, %v376_v16, %v372_v17 }
 0x1d6   : > { %v379_v19 = vadd.f32 1.0, %v377_v18 }
 0x1d8   : > { %v380_v20 = vperm.slane %v379_v19, 0 }
 0x1da   : > { %397 = vperm.xlu1 %585, %v380_v20   ;;  %391 = vperm.xlu0 %584, %v380_v20  }
 0x1db   : > { %385 = vperm.xlu2 %583, %v380_v20  }
 0x1e2   : > { %587 = vset.pattern.permute.xlu0 %v401_v21 }
 0x1e3   : > { %586 = vset.pattern.permute.xlu2 %v401_v21 }
 0x1eb   : > { %403 = vperm.xlu2 %586, %v380_v20  }
 0x235   : > { %v386_v22 = vpop.permute.xlu2 %385 }
 0x236   : > { %v405_v23 = vmul.f32 %v386_v22, %v810_v0  ;;  %v406_v24 = vmul.f32 %v386_v22, %v812_v1 }
 0x238   : > { %413 = vst [vmem:[%s190_s22] sm:$0xff] %v405_v23 }
 0x239   : > { %414 = vst [vmem:[%s190_s22 + $0x8] sm:$0xff] %v406_v24 }
 0x245   : > { %v404_v25 = vpop.permute.xlu2 %403 }
 0x246   : > { %v411_v26 = vmul.f32 %v404_v25, %v828_v9  ;;  %v412_v27 = vmul.f32 %v404_v25, %v830_v10 }
 0x248   : > { %419 = vst [vmem:[%s190_s22 + $0x30] sm:$0xff] %v411_v26 }
 0x249   : > { %420 = vst [vmem:[%s190_s22 + $0x38] sm:$0xff] %v412_v27 }
 0x24c   : > { %v398_v0 = vpop.permute.xlu1 %397  ;;  %v392_v1 = vpop.permute.xlu0 %391 }
 0x24d   : > { %v409_v28 = vmul.f32 %v398_v0, %v814_v2  ;;  %v410_v29 = vmul.f32 %v398_v0, %v820_v5  ;;  %v407_v9 = vmul.f32 %v392_v1, %v824_v7  ;;  %v408_v10 = vmul.f32 %v392_v1, %v826_v8 }
 0x24f   : > { %417 = vst [vmem:[%s190_s22 + $0x20] sm:$0xff] %v409_v28 }
 0x250   : > { %418 = vst [vmem:[%s190_s22 + $0x28] sm:$0xff] %v410_v29 }
 0x251   : > { %415 = vst [vmem:[%s190_s22 + $0x10] sm:$0xff] %v407_v9 }
 0x252   : > { %416 = vst [vmem:[%s190_s22 + $0x18] sm:$0xff] %v408_v10 }
 0x253   : > { %649 = shalt.err (!%p646_p4)
}
 0x254   : > { %s692_s29 = smov 256   ;;  %s693_s17 = smov 16  }
 0x255   : > { %535 = dma.vmem_to_hbm [thread:$0]  (%p764_p11), %s435_s6, 1024, %s437_s23, %s422_s16, %s692_s29, %s692_s29, %s693_s17  }
 0x256 PF: > { %s451_s19 = sand.u32 1, %s676_s12   ;;  %p911_p7 = scmp.ge.s32.totalorder %s688_s15, 2 }
 0x257   : > { %s452_s20 = scalar_lea.sflag [#allocation4], %s451_s19 }
 0x258   : > { %p542_p5 = pnand %p911_p7, %p768_p12 }
 0x25a   : > { %p543_p8 = pneg %p542_p5 }
 0x25c   : > { %671 = dma.done.wait (%p543_p8), %s452_s20, 1024  }
 0x25d   : > { %673 = vsyncadd (%p543_p8), %s452_s20, 4294966272  ;;  %p16_p10 = scmp.ge.s32.totalorder %s739_s18, 4   ;;  %s912_s12 = smov %s680_s13 }
 0x25e   : > { %s913_s13 = smov %s684_s14  ;;  %s914_s14 = smov %s751_s21 }
 0x25f   : > { %s915_s15 = smov %s739_s18  ;;  %18 = sbr.rel (!%p16_p10) target bundleno = 5 (0x5), region = 77 }
 0x264   :  { %458 = vsyncpa [#allocation3], 1 }
 0x265   :  { %460 = vsyncpa [#allocation3 + $0x1], 1 }
 0x266   :  { %461 = vsyncpa [#allocation4], 1 }
 0x267   :  { %463 = vsyncpa [#allocation4 + $0x1], 1 }

</bundles_post_ra>
